<compile_context>
chip_gen: v7x
topology: tpu7x:2x2x1
jax: 0.10.0
libtpu: 0.0.40
codegen_flags: <defaults>
</compile_context>

<pallas_src>
import functools

import jax
import jax.numpy as jnp
import numpy as np
from jax.experimental import pallas as pl
from jax.experimental.pallas import tpu as pltpu


def _round_up(v, m):
    return ((v + m - 1) // m) * m


def _vmem_capacity_bytes():
    # Real per-core VMEM: 128 MiB on v5e/v6e, 64 MiB per TC on v7x.  Fall back
    # to the smallest known capacity so we never request more than physical.
    try:
        return int(pltpu.get_tpu_info().vmem_capacity_bytes)
    except Exception:
        return 64 * 1024 * 1024


def _estimate_vmem_bytes(tT, S_pad, D_pad, itemsize):
    return (2 * tT * D_pad * itemsize        # output tile (double buffered)
            + 2 * S_pad * D_pad * itemsize   # resident x tile (double buffered)
            + 2 * tT * 4                     # src index column (double buffered)
            + 3 * tT * S_pad * 4)            # iota / compare / one-hot temps


def _pick_time_tile(T, S_pad, D_pad, itemsize, vmem_cap):
    # Keep the matmul M dimension a multiple of 128 (full MXU passes, aligned
    # stores).  Prefer 512-frame tiles when VMEM allows (v5e/v6e), 256 on v7x.
    T128 = _round_up(max(int(T), 1), 128)
    budget = 0.6 * vmem_cap
    for tT in (512, 256, 128):
        if tT > T128:
            continue
        if _estimate_vmem_bytes(tT, S_pad, D_pad, itemsize) <= budget:
            return tT
    return 128


def _length_regulator_kernel(mel_len_ref, src_ref, x_ref, out_ref, *, precision):
    # mel_len_ref: (B,) int32 in SMEM (scalar prefetch)
    # src_ref    : (1, tT, 1) int32 -- source row index per output frame
    #              (== S_pad sentinel for frames past this utterance's length)
    # x_ref      : (1, S_pad, D_pad)        out_ref: (1, tT, D_pad)
    tT = out_ref.shape[1]
    S = x_ref.shape[1]
    b = pl.program_id(0)
    t0 = pl.program_id(1) * tT

    @pl.when(t0 >= mel_len_ref[b])
    def _pad_tile():
        # Whole time tile lies past the utterance: skip one-hot + MXU, emit 0s.
        out_ref[...] = jnp.zeros_like(out_ref)

    @pl.when(t0 < mel_len_ref[b])
    def _live_tile():
        src = src_ref[0]                                            # (tT, 1)
        col = jax.lax.broadcasted_iota(jnp.int32, (tT, S), 1)       # (tT, S)
        # Single equality compare; sentinel src == S_pad matches nothing -> 0 row.
        onehot = (src == col).astype(x_ref.dtype)
        out = jnp.dot(onehot, x_ref[0],
                      preferred_element_type=jnp.float32,
                      precision=precision)
        out_ref[0] = out.astype(out_ref.dtype)


def length_regulator(x, duration, max_len, mel_lens=None):
    """x: (B, S, D) float, duration: (B, S) int, max_len: static int (or None).

    Returns (output (B, max_len, D), mel_len (B,) int32), matching the PyTorch
    LengthRegulator forward."""
    B, S, D = x.shape

    dur = jnp.maximum(duration.astype(jnp.int32), 0)                 # (B, S)
    mel_len = jnp.sum(dur, axis=-1).astype(jnp.int32)                # (B,)

    if max_len is None:
        # Eager-only fallback: pad to the batch max (mirrors pad(output)).
        T = int(jax.device_get(jnp.max(mel_len)))
    else:
        T = int(max_len)
    T = max(T, 1)

    # Lane-friendly padding: padded source rows get duration 0 -> never selected.
    S_pad = _round_up(S, 128)
    D_pad = _round_up(D, 128)
    itemsize = jnp.dtype(x.dtype).itemsize
    vmem_cap = _vmem_capacity_bytes()
    tT = _pick_time_tile(T, S_pad, D_pad, itemsize, vmem_cap)
    T_pad = _round_up(T, tT)

    x_p = jnp.pad(x, ((0, 0), (0, S_pad - S), (0, D_pad - D)))
    dur_p = jnp.pad(dur, ((0, 0), (0, S_pad - S)))

    # frame -> source-row index, computed once in plain JAX:
    #   src[b, t] = #{i : cum_incl[b, i] <= t}
    # For a frame inside row i this is exactly i (zero-duration rows are never
    # hit); for t >= mel_len[b] every row is counted, giving S_pad -- a natural
    # out-of-range sentinel the kernel's equality one-hot turns into a 0 row.
    cum_incl = jnp.cumsum(dur_p, axis=-1).astype(jnp.int32)          # (B, S_pad)
    t_idx = jnp.arange(T_pad, dtype=jnp.int32)                       # (T_pad,)
    src = jax.vmap(
        functools.partial(jnp.searchsorted, side="right"),
        in_axes=(0, None))(cum_incl, t_idx).astype(jnp.int32)        # (B, T_pad)
    src3 = src.reshape(B, T_pad, 1)

    est = _estimate_vmem_bytes(tT, S_pad, D_pad, itemsize)
    vmem_limit = int(max(32 * 1024 * 1024, 2 * est))
    vmem_limit = int(min(vmem_limit, 0.8 * vmem_cap))                # <=51 MiB v7x

    # For f32 inputs pin the MXU precision so the one-hot row copy is exact
    # (default precision could truncate through a single bf16 pass).
    precision = jax.lax.Precision.HIGHEST if x.dtype == jnp.float32 else None
    kernel = functools.partial(_length_regulator_kernel, precision=precision)

    out_p = pl.pallas_call(
        kernel,
        out_shape=jax.ShapeDtypeStruct((B, T_pad, D_pad), x.dtype),
        grid_spec=pltpu.PrefetchScalarGridSpec(
            num_scalar_prefetch=1,               # mel_len -> SMEM
            grid=(B, T_pad // tT),
            in_specs=[
                pl.BlockSpec((1, tT, 1), lambda b, t, ml: (b, t, 0)),
                pl.BlockSpec((1, S_pad, D_pad), lambda b, t, ml: (b, 0, 0)),
            ],
            out_specs=pl.BlockSpec((1, tT, D_pad), lambda b, t, ml: (b, t, 0)),
        ),
        compiler_params=pltpu.CompilerParams(
            dimension_semantics=("parallel", "parallel"),
            vmem_limit_bytes=vmem_limit),
    )(mel_len, src3, x_p)

    # Only pay the crop copy when padding actually added slack.
    out = out_p if (T_pad == T and D_pad == D) else out_p[:, :T, :D]

    if mel_lens is not None:
        mel_len = mel_lens
    return out, mel_len


def _reference(x, duration, max_len):
    # Pure numpy reference mirroring the PyTorch loop.
    x = np.asarray(x)
    duration = np.asarray(duration)
    B, S, D = x.shape
    out = np.zeros((B, max_len, D), dtype=x.dtype)
    mel_len = np.zeros((B,), dtype=np.int32)
    for b in range(B):
        rows = []
        for i in range(S):
            r = max(int(duration[b, i]), 0)
            rows.extend([x[b, i]] * r)
        mel_len[b] = len(rows)
        rows = rows[:max_len]
        if rows:
            out[b, : len(rows)] = np.stack(rows, 0)
    return out, mel_len


if __name__ == "__main__":
    key = jax.random.PRNGKey(0)
    k1, k2 = jax.random.split(key)

    B, S, D = 2, 8, 32
    max_len = 24  # >= worst-case sum of durations (8 * 3)

    x = jax.random.normal(k1, (B, S, D), dtype=jnp.float32)
    duration = jax.random.randint(k2, (B, S), 0, 4, dtype=jnp.int32)

    out, mel_len = length_regulator(x, duration, max_len)
    out = jax.block_until_ready(out)
    mel_len = jax.block_until_ready(mel_len)

    ref_out, ref_len = _reference(x, duration, max_len)
    np.testing.assert_allclose(np.asarray(out), ref_out, rtol=1e-5, atol=1e-5)
    np.testing.assert_array_equal(np.asarray(mel_len), ref_len)

    print("KERNEL_OK")
</pallas_src>

<mosaic_0001>
module attributes {stable_mosaic.version = 11 : i64} {
  func.func @_length_regulator_kernel(%arg0: i32, %arg1: i32, %arg2: memref<2xi32, #tpu.memory_space<smem>>, %arg3: memref<1x128x1xi32, #tpu.memory_space<vmem>>, %arg4: memref<1x128x128xf32, #tpu.memory_space<vmem>>, %arg5: memref<1x128x128xf32, #tpu.memory_space<vmem>>) attributes {dimension_semantics = [#tpu.dimension_semantics<parallel>, #tpu.dimension_semantics<parallel>], iteration_bounds = array<i64: 2, 1>, scalar_prefetch = 1 : i64, scratch_operands = 0 : i64, tpu.core_type = #tpu.core_type<tc>, window_params = [{transform_indices = @transform_0, window_bounds = array<i64: 1, 128, 1>}, {transform_indices = @transform_1, window_bounds = array<i64: 1, 128, 128>}, {transform_indices = @transform_2, window_bounds = array<i64: 1, 128, 128>}]} {
    %c128_i32 = arith.constant 128 : i32
    %0 = arith.muli %arg1, %c128_i32 : i32
    %1 = arith.index_cast %arg0 : i32 to index
    %2 = memref.load %arg2[%1] : memref<2xi32, #tpu.memory_space<smem>>
    %3 = arith.cmpi sge, %0, %2 : i32
    %4 = arith.extui %3 : i1 to i32
    %c0_i32 = arith.constant 0 : i32
    %5 = arith.cmpi ne, %4, %c0_i32 : i32
    scf.if %5 {
      %cst = arith.constant 0.000000e+00 : f32
      %11 = vector.broadcast %cst : f32 to vector<1x128x128xf32>
      %c0 = arith.constant 0 : index
      %c0_1 = arith.constant 0 : index
      %c0_2 = arith.constant 0 : index
      %12 = vector.load %arg5[%c0, %c0_1, %c0_2] : memref<1x128x128xf32, #tpu.memory_space<vmem>>, vector<1x128x128xf32>
      tpu.vector_store %arg5[%c0, %c0_1, %c0_2], %11 {strides = array<i32>} : memref<1x128x128xf32, #tpu.memory_space<vmem>>, vector<1x128x128xf32>,
    } else {
    }
    %6 = arith.index_cast %arg0 : i32 to index
    %7 = memref.load %arg2[%6] : memref<2xi32, #tpu.memory_space<smem>>
    %8 = arith.cmpi slt, %0, %7 : i32
    %9 = arith.extui %8 : i1 to i32
    %c0_i32_0 = arith.constant 0 : i32
    %10 = arith.cmpi ne, %9, %c0_i32_0 : i32
    scf.if %10 {
      %c0 = arith.constant 0 : index
      %c0_1 = arith.constant 0 : index
      %c0_2 = arith.constant 0 : index
      %11 = vector.load %arg3[%c0, %c0_1, %c0_2] : memref<1x128x1xi32, #tpu.memory_space<vmem>>, vector<1x128x1xi32>
      %12 = vector.shape_cast %11 : vector<1x128x1xi32> to vector<128x1xi32>
      %13 = tpu.iota {dimensions = array<i32: 1>} : vector<128x128xi32>
      %14 = vector.broadcast %12 : vector<128x1xi32> to vector<128x128xi32>
      %15 = arith.cmpi eq, %14, %13 : vector<128x128xi32>
      %16 = arith.extui %15 : vector<128x128xi1> to vector<128x128xi32>
      %17 = arith.sitofp %16 : vector<128x128xi32> to vector<128x128xf32>
      %c0_3 = arith.constant 0 : index
      %c0_4 = arith.constant 0 : index
      %c0_5 = arith.constant 0 : index
      %18 = vector.load %arg4[%c0_3, %c0_4, %c0_5] : memref<1x128x128xf32, #tpu.memory_space<vmem>>, vector<1x128x128xf32>
      %19 = vector.shape_cast %18 : vector<1x128x128xf32> to vector<128x128xf32>
      %cst = arith.constant dense<0.000000e+00> : vector<128x128xf32>
      %20 = tpu.matmul %17, %19, %cst {dimension_numbers = #tpu.dot_dimension_numbers<[1], [0], [0], [1], [0, 0, 1, 1], [], []>, precision = #tpu.contract_precision<fp32>} : vector<128x128xf32>, vector<128x128xf32>, vector<128x128xf32> -> vector<128x128xf32>
      %c0_6 = arith.constant 0 : index
      %c0_7 = arith.constant 0 : index
      %c0_8 = arith.constant 0 : index
      %21 = vector.load %arg5[%c0_6, %c0_7, %c0_8] : memref<1x128x128xf32, #tpu.memory_space<vmem>>, vector<1x128x128xf32>
      %22 = vector.shape_cast %21 : vector<1x128x128xf32> to vector<128x128xf32>
      %23 = vector.shape_cast %20 : vector<128x128xf32> to vector<1x128x128xf32>
      tpu.vector_store %arg5[%c0_6, %c0_7, %c0_8], %23 {strides = array<i32>} : memref<1x128x128xf32, #tpu.memory_space<vmem>>, vector<1x128x128xf32>,
    } else {
    }
    return
  }
  func.func @transform_0(%arg0: i32, %arg1: i32, %arg2: memref<2xi32, #tpu.memory_space<smem>>) -> (i32, i32, i32) {
    %c0_i32 = arith.constant 0 : i32
    %c0_i32_0 = arith.constant 0 : i32
    return %arg0, %arg1, %c0_i32 : i32, i32, i32
  }
  func.func @transform_1(%arg0: i32, %arg1: i32, %arg2: memref<2xi32, #tpu.memory_space<smem>>) -> (i32, i32, i32) {
    %c0_i32 = arith.constant 0 : i32
    %c0_i32_0 = arith.constant 0 : i32
    %c0_i32_1 = arith.constant 0 : i32
    return %arg0, %c0_i32, %c0_i32_0 : i32, i32, i32
  }
  func.func @transform_2(%arg0: i32, %arg1: i32, %arg2: memref<2xi32, #tpu.memory_space<smem>>) -> (i32, i32, i32) {
    %c0_i32 = arith.constant 0 : i32
    %c0_i32_0 = arith.constant 0 : i32
    return %arg0, %arg1, %c0_i32 : i32, i32, i32
  }
}

</mosaic_0001>

<bundles_post_ra>
// kernel: tpu_custom_call.1
= control target key start
LH: loop header
LB: loop body
LE: loop exit
PB: predicated region body
PF: predicated region fallthrough
CT: control target
= control target key end

     0   :  { %s3701_s0 = inlined_call_operand.vmem [shape: s32[2], index: 0, kind: input, shape index: {}]   ;;  %s3702_s1 = inlined_call_operand.vmem [shape: s32[2,128,1], index: 1, kind: input, shape index: {}]   ;;  %s3703_s2 = inlined_call_operand.vmem [shape: f32[2,128,128], index: 2, kind: input, shape index: {}]   ;;  %s3704_s3 = inlined_call_operand.hbm [shape: f32[2,128,128], index: 3, kind: output, shape index: {}]  }
   0x1   :  { %s8_s14 = sshll.u32 %s3701_s0, 4  ;;  %s9_s14 = int_to_ptr.vmem [resolvable:$true] %s8_s14 }
   0x2   :  { %s2716_s15 = scalar_lea.vmem %s9_s14, 16  ;;  %p2721_p1 = scmp.lt.s32.totalorder %s9_s14, %s9_s14 }
   0x3   :  { %p2717_p0 = scmp.ne.s32.totalorder %s9_s14, %s2716_s15  ;;  %p2722_p2 = scmp.lt.s32.totalorder %s2716_s15, %s2716_s15 }
   0x5   :  { %p2723_p3 = por %p2722_p2, %p2721_p1 }
   0x7   :  { %p2724_p4 = pnand %p2723_p3, %p2717_p0 }
   0x9   :  { %2727 = shalt.err (!%p2724_p4)  }
   0xa   :  { %s2810_s16 = smov [#allocation3]  }
   0xb   :  { %11 = dma.vmem_to_smem %s9_s14, 16, %s2810_s16, [#allocation2] }
   0xc   :  { %2780 = dma.done.wait [#allocation2], 16 }
   0xd   :  { %2781 = vsyncadd [#allocation2], 4294967280 }
   0xe   :  { %13 = sfence }
   0xf   :  { %14 = vsyncpa [#allocation5], 0 }
  0x10   :  { %16 = vsyncpa [#allocation5 + $0x1], 0  ;;  %s2841_s17 = smov 0   ;;  %s2843_s18 = smov 0  }
  0x11   :  { %s2845_s0 = smov 0   ;;  %s2847_s19 = smov 0  }
  0x12   :  { %s2849_s20 = smov 0   ;;  %s2851_s21 = smov 0  }
  0x13 LB: > { %s1766_s22 = sadd.s32 4294967295, %s2808_s21   ;;  %s1767_s23 = sadd.s32 4294967294, %s2808_s21   ;;  %s2808_s21 = sphi %s2851_s21, %s22_s21   ;;  %s2804_s20 = sphi %s2849_s20, %s3729_s20   ;;  %s2800_s19 = sphi %s2847_s19, %s3728_s19   ;;  %s2796_s0 = sphi %s2845_s0, %s3727_s0   ;;  %s2792_s18 = sphi %s2843_s18, %s3726_s18   ;;  %s2788_s17 = sphi %s2841_s17, %s3725_s17  }
  0x14   : > { %s34_s24 = sadd.s32 1, %s2804_s20  ;;  %s97_s25 = sadd.s32 1, %s2796_s0 }
  0x15   : > { %p36_p5 = scmp.ge.s32.totalorder %s34_s24, 2  ;;  %p107_p6 = scmp.ne.s32.totalorder %s2796_s0, %s2792_s18 }
  0x16   : > { %p108_p7 = scmp.eq.s32.totalorder %s1766_s22, 1  ;;  %p113_p8 = scmp.ne.s32.totalorder %s2792_s18, %s2788_s17 }
  0x17   : > { %s3731_s24 = smov (%p36_p5, %s34_s24), 0  ;;  %p114_p10 = scmp.eq.s32.totalorder %s1767_s23, 1 }
  0x18   : > { %p2881_p9 = por %p108_p7, %p107_p6  ;;  %s92_s27 = ssub.s32 %s2804_s20, %s3731_s24 }
  0x19   : > { %p1770_p11 = scmp.ge.s32.totalorder %s2808_s21, 1  ;;  %p95_p12 = scmp.eq.s32.totalorder %s92_s27, 0 }
  0x1a   : > { %p2888_p13 = por %p114_p10, %p113_p8  ;;  %p153_p0 = scmp.lt.s32.totalorder %s2808_s21, 3 }
  0x1b   : > { %s2894_s29 = scalar_select %p95_p12, %s2796_s0, %s97_s25  }
  0x1c   : > { %p154_p1 = pnand %p1770_p11, %p153_p0 }
  0x1d   : > { %s181_s30 = sand.u32 (!%p154_p1), 1, %s2792_s18   ;;  %p185_p2 = scmp.lt.s32.totalorder (!%p154_p1), %s2800_s19, 1 }
  0x1e   : > { %157 = sbr.rel (%p154_p1) target bundleno = 540 (0x21c), region = 28  ;;  %s1771_s4 = sshll.u32 (!%p154_p1), %s181_s30, 7 }
  0x1f   : > { %s201_s5 = sld [smem:[#allocation3 + %s2800_s19]] (!%p154_p1)  ;;  %s2912_s14 = scalar_lea.vmem (!%p154_p1), [#allocation4], %s1771_s4 }
  0x25   : > { %s186_s6 = scalar_select %p185_p2, %s2800_s19, 1 }
  0x26   : > { %p1777_p3 = scmp.gt.s32.totalorder %s201_s5, 0 }
  0x27   : > { %s1849_s7 = sshll.u32 %s186_s6, 7  ;;  %v2811_v0 = vmov (!%p1777_p3), 0.0  }
  0x28   : > { %s2905_s10 = scalar_lea.vmem %s3702_s1, %s1849_s7  ;;  %s2910_s13 = scalar_lea.vmem %s3703_s2, %s1849_s7  ;;  %206 = vst [vmem:[%s2912_s14] sm:$0xff] (!%p1777_p3), %v2811_v0  ;;  %207 = vst [vmem:[%s2912_s14 + $0x8] sm:$0xff] (!%p1777_p3), %v2811_v0 }
  0x29   : > { %205 = sbr.rel (%p1777_p3) target bundleno = 48 (0x30), region = 32  ;;  %208 = vst [vmem:[%s2912_s14 + $0x10] sm:$0xff] (!%p1777_p3), %v2811_v0  ;;  %209 = vst [vmem:[%s2912_s14 + $0x18] sm:$0xff] (!%p1777_p3), %v2811_v0 }
  0x2a   : > { %210 = vst [vmem:[%s2912_s14 + $0x20] sm:$0xff] (!%p1777_p3), %v2811_v0  ;;  %211 = vst [vmem:[%s2912_s14 + $0x28] sm:$0xff] (!%p1777_p3), %v2811_v0 }
  0x2b   : > { %212 = vst [vmem:[%s2912_s14 + $0x30] sm:$0xff] (!%p1777_p3), %v2811_v0  ;;  %213 = vst [vmem:[%s2912_s14 + $0x38] sm:$0xff] (!%p1777_p3), %v2811_v0 }
  0x2c   : > { %214 = vst [vmem:[%s2912_s14 + $0x40] sm:$0xff] (!%p1777_p3), %v2811_v0  ;;  %215 = vst [vmem:[%s2912_s14 + $0x48] sm:$0xff] (!%p1777_p3), %v2811_v0 }
  0x2d   : > { %216 = vst [vmem:[%s2912_s14 + $0x50] sm:$0xff] (!%p1777_p3), %v2811_v0  ;;  %217 = vst [vmem:[%s2912_s14 + $0x58] sm:$0xff] (!%p1777_p3), %v2811_v0 }
  0x2e   : > { %218 = vst [vmem:[%s2912_s14 + $0x60] sm:$0xff] (!%p1777_p3), %v2811_v0  ;;  %219 = vst [vmem:[%s2912_s14 + $0x68] sm:$0xff] (!%p1777_p3), %v2811_v0 }
  0x2f   : > { %220 = vst [vmem:[%s2912_s14 + $0x70] sm:$0xff] (!%p1777_p3), %v2811_v0  ;;  %221 = vst [vmem:[%s2912_s14 + $0x78] sm:$0xff] (!%p1777_p3), %v2811_v0 }
  0x30 PF: > { %s222_s15 = sld [smem:[#allocation3 + %s2800_s19]] }
  0x36   : > { %p1779_p4 = scmp.le.s32.totalorder %s222_s15, 0 }
  0x38   : > { %226 = sbr.rel (%p1779_p4) target bundleno = 515 (0x203), region = 36 }
  0x3f   : > { %v229_v1 = vld [vmem:[%s2905_s10 + $0x10] sm:$0xff]  ;;  %v227_v2 = vld [vmem:[%s2905_s10] sm:$0xff]  ;;  %v2812_v3 = vmov 0   ;;  %v230_v4 = vld [vmem:[%s2905_s10 + $0x18] sm:$0xff] }
  0x40   : > { %2715 = vset.pattern.permute.xlu1 %v2812_v3  ;;  %2714 = vset.pattern.permute.xlu0 %v2812_v3  ;;  %v228_v5 = vld [vmem:[%s2905_s10 + $0x8] sm:$0xff]  ;;  %v2936_v6 = vld [vmem:[%s2910_s13] sm:$0xff]  ;;  %v343_v10 = vld [vmem:[%s2910_s13 + $0x10] sm:$0xff] }
  0x41   : > { %252 = vperm.xlu1 %2715, %v229_v1   ;;  %246 = vperm.xlu0 %2714, %v227_v2   ;;  %v2939_v7 = vld [vmem:[%s2910_s13 + $0x8] sm:$0xff]  ;;  %v358_v8 = vand.u32 4294901760, %v2936_v6  ;;  %v344_v11 = vld [vmem:[%s2910_s13 + $0x18] sm:$0xff]  ;;  %v345_v12 = vld [vmem:[%s2910_s13 + $0x20] sm:$0xff]  ;;  %v364_v15 = vand.u32 4294901760, %v343_v10 }
  0x42   : > { %v361_v9 = vand.u32 4294901760, %v2939_v7  ;;  %v232_v13 = vld [vmem:[%s2905_s10 + $0x28] sm:$0xff]  ;;  %v231_v14 = vld [vmem:[%s2905_s10 + $0x20] sm:$0xff]  ;;  %v367_v16 = vand.u32 4294901760, %v344_v11  ;;  %v370_v20 = vand.u32 4294901760, %v345_v12  ;;  %v347_v22 = vld [vmem:[%s2910_s13 + $0x30] sm:$0xff] }
  0x43   : > { %v346_v17 = vld [vmem:[%s2910_s13 + $0x28] sm:$0xff]  ;;  %v348_v23 = vld [vmem:[%s2910_s13 + $0x38] sm:$0xff]  ;;  %v233_v25 = vld [vmem:[%s2905_s10 + $0x30] sm:$0xff]  ;;  %v376_v27 = vand.u32 4294901760, %v347_v22  ;;  %v2974_v32 = vsub.f32 %v343_v10, %v364_v15  ;;  %v3021_v60 = vsub.f32 %v2936_v6, %v358_v8 }
  0x44   : > { %v2953_v18 = vpack.c.bf16 %v361_v9, %v358_v8  ;;  %v2955_v19 = vpack.c.bf16 %v367_v16, %v364_v15  ;;  %v373_v21 = vand.u32 4294901760, %v346_v17  ;;  %v234_v24 = vld [vmem:[%s2905_s10 + $0x38] sm:$0xff]  ;;  %v379_v28 = vand.u32 4294901760, %v348_v23  ;;  %v349_v29 = vld [vmem:[%s2910_s13 + $0x40] sm:$0xff]  ;;  %v350_v30 = vld [vmem:[%s2910_s13 + $0x48] sm:$0xff] }
  0x45   : > { %255 = vperm.xlu1 %2715, %v230_v4   ;;  %249 = vperm.xlu0 %2714, %v228_v5   ;;  %v2972_v31 = vld [vmem:[%s2910_s13 + $0x50] sm:$0xff]  ;;  %v236_v33 = vld [vmem:[%s2905_s10 + $0x48] sm:$0xff]  ;;  %v2977_v34 = vsub.f32 %v344_v11, %v367_v16  ;;  %v235_v35 = vld [vmem:[%s2905_s10 + $0x40] sm:$0xff]  ;;  %v615_v38 = vand.u32 4294901760, %v2974_v32  ;;  %v2987_v39 = vsub.f32 %v345_v12, %v370_v20  ;;  %v382_v41 = vand.u32 4294901760, %v349_v29 }
  0x46   : > { %2477 = vmatprep.subr.bf16.mxu0 %v2953_v18  ;;  %2381 = vmatprep.subr.bf16.mxu1 %v2953_v18  ;;  %v2967_v26 = vpack.c.bf16 %v373_v21, %v370_v20  ;;  %v2981_v36 = vld [vmem:[%s2910_s13 + $0x58] sm:$0xff]  ;;  %v2984_v37 = vld [vmem:[%s2910_s13 + $0x60] sm:$0xff]  ;;  %v2989_v40 = vsub.f32 %v346_v17, %v373_v21  ;;  %v385_v42 = vand.u32 4294901760, %v350_v30  ;;  %v388_v43 = vand.u32 4294901760, %v2972_v31  ;;  %v237_v54 = vld [vmem:[%s2905_s10 + $0x50] sm:$0xff] }
  0x47   : > { %2479 = vmatpush3.bf16.msra.mxu0 %v2953_v18  ;;  %2383 = vmatpush3.bf16.msra.mxu1 %v2953_v18  ;;  %v622_v44 = vand.u32 4294901760, %v2977_v34  ;;  %v2997_v45 = vpack.c.bf16 %v379_v28, %v376_v27  ;;  %v616_v46 = vsub.f32 %v2974_v32, %v615_v38  ;;  %v629_v47 = vand.u32 4294901760, %v2987_v39  ;;  %v238_v53 = vld [vmem:[%s2905_s10 + $0x58] sm:$0xff]  ;;  %v3010_v55 = vld [vmem:[%s2910_s13 + $0x68] sm:$0xff]  ;;  %v239_v11 = vld [vmem:[%s2905_s10 + $0x60] sm:$0xff] }
  0x48   : > { %2481 = vmatprep.subr.bf16.mxu0 %v2955_v19  ;;  %2385 = vmatprep.subr.bf16.mxu1 %v2955_v19  ;;  %v636_v48 = vand.u32 4294901760, %v2989_v40  ;;  %v391_v49 = vand.u32 4294901760, %v2981_v36  ;;  %v394_v50 = vand.u32 4294901760, %v2984_v37  ;;  %v3023_v62 = vsub.f32 %v347_v22, %v376_v27  ;;  %v240_v10 = vld [vmem:[%s2905_s10 + $0x68] sm:$0xff]  ;;  %v3044_v12 = vld [vmem:[%s2910_s13 + $0x70] sm:$0xff]  ;;  %v356_v21 = vld [vmem:[%s2910_s13 + $0x78] sm:$0xff] }
  0x49   : > { %261 = vperm.xlu1 %2715, %v232_v13   ;;  %258 = vperm.xlu0 %2714, %v231_v14   ;;  %v3004_v51 = vpack.c.bf16 %v622_v44, %v615_v38  ;;  %v623_v52 = vsub.f32 %v2977_v34, %v622_v44  ;;  %v617_v56 = vand.u32 4294901760, %v616_v46  ;;  %v630_v58 = vsub.f32 %v2987_v39, %v629_v47 }
  0x4a   : > { %v3012_v57 = vpack.c.bf16 %v636_v48, %v629_v47  ;;  %v637_v59 = vsub.f32 %v2989_v40, %v636_v48  ;;  %v3025_v63 = vsub.f32 %v348_v23, %v379_v28  ;;  %v3029_v0 = vpack.c.bf16 %v385_v42, %v382_v41 }
  0x4b   : > { %2483 = vmatpush3.bf16.msra.mxu0 %v2955_v19  ;;  %2387 = vmatpush3.bf16.msra.mxu1 %v2955_v19  ;;  %v624_v61 = vand.u32 4294901760, %v623_v52  ;;  %v3034_v1 = vsub.f32 %v2939_v7, %v361_v9  ;;  %v631_v2 = vand.u32 4294901760, %v630_v58  ;;  %v397_v4 = vand.u32 4294901760, %v3010_v55 }
  0x4c   : > { %2485 = vmatprep.subr.bf16.mxu0 %v2967_v26  ;;  %2389 = vmatprep.subr.bf16.mxu1 %v2967_v26  ;;  %v638_v3 = vand.u32 4294901760, %v637_v59  ;;  %v643_v6 = vand.u32 4294901760, %v3023_v62  ;;  %v650_v8 = vand.u32 4294901760, %v3025_v63  ;;  %v3048_v7 = vsub.f32 %v349_v29, %v382_v41 }
  0x4d   : > { %267 = vperm.xlu1 %2715, %v234_v24   ;;  %264 = vperm.xlu0 %2714, %v233_v25   ;;  %v3037_v5 = vpack.c.bf16 %v624_v61, %v617_v56  ;;  %v3050_v9 = vsub.f32 %v350_v30, %v385_v42  ;;  %v601_v14 = vand.u32 4294901760, %v3021_v60  ;;  %v3065_v20 = vpack.c.bf16 %v391_v49, %v388_v43  ;;  %v242_v30 = vld [vmem:[%s2905_s10 + $0x78] sm:$0xff] }
  0x4e   : > { %v3046_v13 = vpack.c.bf16 %v638_v3, %v631_v2  ;;  %v3055_v15 = vpack.c.bf16 %v650_v8, %v643_v6  ;;  %v644_v16 = vsub.f32 %v3023_v62, %v643_v6  ;;  %v651_v17 = vsub.f32 %v3025_v63, %v650_v8 }
  0x4f   : > { %2487 = vmatpush3.bf16.msra.mxu0 %v2967_v26  ;;  %2391 = vmatpush3.bf16.msra.mxu1 %v2967_v26  ;;  %v608_v22 = vand.u32 4294901760, %v3034_v1  ;;  %v657_v23 = vand.u32 4294901760, %v3048_v7  ;;  %v664_v24 = vand.u32 4294901760, %v3050_v9  ;;  %v3073_v25 = vpack.c.bf16 %v397_v4, %v394_v50 }
  0x50   : > { %2489 = vmatprep.subr.bf16.mxu0 %v2997_v45  ;;  %2393 = vmatprep.subr.bf16.mxu1 %v2997_v45  ;;  %v400_v27 = vand.u32 4294901760, %v3044_v12  ;;  %v645_v28 = vand.u32 4294901760, %v644_v16  ;;  %v652_v29 = vand.u32 4294901760, %v651_v17  ;;  %v3085_v42 = vsub.f32 %v2972_v31, %v388_v43 }
  0x51   : > { %273 = vperm.xlu1 %2715, %v236_v33   ;;  %270 = vperm.xlu0 %2714, %v235_v35   ;;  %v241_v33 = vld [vmem:[%s2905_s10 + $0x70] sm:$0xff]  ;;  %v3078_v35 = vpack.c.bf16 %v664_v24, %v657_v23  ;;  %v658_v38 = vsub.f32 %v3048_v7, %v657_v23  ;;  %v665_v41 = vsub.f32 %v3050_v9, %v664_v24  ;;  %v403_v44 = vand.u32 4294901760, %v356_v21 }
  0x52   : > { %v602_v46 = vsub.f32 %v3021_v60, %v601_v14  ;;  %v3090_v47 = vpack.c.bf16 %v652_v29, %v645_v28  ;;  %v677_v48 = vsub.f32 %v2981_v36, %v391_v49  ;;  %v609_v31 = vsub.f32 %v3034_v1, %v608_v22 }
  0x53   : > { %2491 = vmatpush3.bf16.msra.mxu0 %v2997_v45  ;;  %2395 = vmatpush3.bf16.msra.mxu1 %v2997_v45  ;;  %v659_v43 = vand.u32 4294901760, %v658_v38  ;;  %v666_v52 = vand.u32 4294901760, %v665_v41  ;;  %v684_v36 = vsub.f32 %v2984_v37, %v394_v50  ;;  %v691_v49 = vsub.f32 %v3010_v55, %v397_v4 }
  0x54   : > { %2493 = vmatprep.subr.bf16.mxu0 %v3029_v0  ;;  %2397 = vmatprep.subr.bf16.mxu1 %v3029_v0  ;;  %v3108_v59 = vpack.c.bf16 %v403_v44, %v400_v27  ;;  %v603_v61 = vand.u32 4294901760, %v602_v46  ;;  %v610_v6 = vand.u32 4294901760, %v609_v31  ;;  %v698_v16 = vsub.f32 %v3044_v12, %v400_v27 }
  0x55   : > { %279 = vperm.xlu1 %2715, %v238_v53   ;;  %276 = vperm.xlu0 %2714, %v237_v54   ;;  %v671_v53 = vand.u32 4294901760, %v3085_v42  ;;  %v678_v54 = vand.u32 4294901760, %v677_v48  ;;  %v3099_v56 = vpack.c.bf16 %v666_v52, %v659_v43  ;;  %v692_v37 = vand.u32 4294901760, %v691_v49 }
  0x56   : > { %v3119_v17 = vpack.c.bf16 %v608_v22, %v601_v14  ;;  %v705_v24 = vsub.f32 %v356_v21, %v403_v44  ;;  %v3125_v28 = vpack.c.bf16 %v610_v6, %v603_v61  ;;  %v3139_v46 = vpack.c.bf16 %v3034_v1, %v3021_v60 }
  0x57   : > { %2495 = vmatpush3.bf16.msra.mxu0 %v3029_v0  ;;  %2399 = vmatpush3.bf16.msra.mxu1 %v3029_v0  ;;  %v672_v58 = vsub.f32 %v3085_v42, %v671_v53  ;;  %v3110_v2 = vpack.c.bf16 %v678_v54, %v671_v53  ;;  %v679_v3 = vsub.f32 %v677_v48, %v678_v54 }
  0x58   : > { %2497 = vmatprep.subr.bf16.mxu0 %v3065_v20  ;;  %2401 = vmatprep.subr.bf16.mxu1 %v3065_v20  ;;  %v706_v38 = vand.u32 4294901760, %v705_v24  ;;  %v3143_v31 = vpack.c.bf16 %v2977_v34, %v2974_v32  ;;  %v3147_v43 = vpack.c.bf16 %v2989_v40, %v2987_v39  ;;  %v3151_v52 = vpack.c.bf16 %v3025_v63, %v3023_v62 }
  0x59   : > { %285 = vperm.xlu1 %2715, %v240_v10   ;;  %282 = vperm.xlu0 %2714, %v239_v11   ;;  %v673_v8 = vand.u32 4294901760, %v672_v58  ;;  %v685_v10 = vand.u32 4294901760, %v684_v36  ;;  %v680_v50 = vand.u32 4294901760, %v679_v3  ;;  %v693_v11 = vsub.f32 %v691_v49, %v692_v37 }
  0x5a   : > { %v707_v21 = vsub.f32 %v705_v24, %v706_v38  ;;  %v3155_v53 = vpack.c.bf16 %v3050_v9, %v3048_v7  ;;  %v3158_v54 = vpack.c.bf16 %v677_v48, %v3085_v42  ;;  %v3160_v60 = vpack.c.bf16 %v691_v49, %v684_v36 }
  0x5b   : > { %2499 = vmatpush3.bf16.msra.mxu0 %v3065_v20  ;;  %2403 = vmatpush3.bf16.msra.mxu1 %v3065_v20  ;;  %v3114_v55 = vpack.c.bf16 %v692_v37, %v685_v10  ;;  %v686_v4 = vsub.f32 %v684_v36, %v685_v10  ;;  %v3121_v23 = vpack.c.bf16 %v680_v50, %v673_v8  ;;  %v243_v32 = vlaneseq }
  0x5c   : > { %2501 = vmatprep.subr.bf16.mxu0 %v3073_v25  ;;  %2405 = vmatprep.subr.bf16.mxu1 %v3073_v25  ;;  %v708_v41 = vand.u32 4294901760, %v707_v21  ;;  %v3162_v1 = vpack.c.bf16 %v705_v24, %v698_v16  ;;  %v3705_v62 = vmov 0.0  }
  0x5d   : > { %291 = vperm.xlu1 %2715, %v242_v30   ;;  %288 = vperm.xlu0 %2714, %v241_v33   ;;  %v687_v29 = vand.u32 4294901760, %v686_v4  ;;  %v694_v30 = vand.u32 4294901760, %v693_v11  ;;  %v699_v33 = vand.u32 4294901760, %v698_v16  ;;  %v3164_v34 = vand.u32 127, %v243_v32 }
  0x5f   : > { %2503 = vmatpush3.bf16.msra.mxu0 %v3073_v25  ;;  %2407 = vmatpush3.bf16.msra.mxu1 %v3073_v25  ;;  %v3127_v12 = vpack.c.bf16 %v694_v30, %v687_v29  ;;  %v700_v27 = vsub.f32 %v698_v16, %v699_v33  ;;  %v3131_v14 = vpack.c.bf16 %v706_v38, %v699_v33 }
  0x60   : > { %2505 = vmatprep.subr.bf16.mxu0 %v3108_v59  ;;  %2409 = vmatprep.subr.bf16.mxu1 %v3108_v59 }
  0x61   : > { %v701_v22 = vand.u32 4294901760, %v700_v27 }
  0x63   : > { %2507 = vmatpush3.bf16.msra.mxu0 %v3108_v59  ;;  %2411 = vmatpush3.bf16.msra.mxu1 %v3108_v59  ;;  %v3135_v44 = vpack.c.bf16 %v708_v41, %v701_v22 }
  0x64   : > { %2509 = vmatprep.subr.bf16.mxu0 %v3119_v17  ;;  %2413 = vmatprep.subr.bf16.mxu1 %v3125_v28 }
  0xc0   : > { %v3166_v39 = vpop.permute.xlu1 %252  ;;  %v3168_v40 = vpop.permute.xlu0 %246 }
  0xc1   : > { %vm295_vm0 = vcmp.eq.s32.totalorder %v3166_v39, %v3164_v34  ;;  %vm293_vm1 = vcmp.eq.s32.totalorder %v3168_v40, %v3164_v34 }
  0xc2   : > { %v1782_v63 = vsel %vm295_vm0, 1.0, %v3705_v62  ;;  %v1780_v7 = vsel %vm293_vm1, 1.0, %v3705_v62 }
  0xc3   : > { %v3182_v9 = vsub.f32 %v1782_v63, %v1782_v63  ;;  %v3184_v42 = vsub.f32 %v1780_v7, %v1780_v7 }
  0xc4   : > { %v3186_v48 = vpop.permute.xlu1 %255  ;;  %v3188_v58 = vpop.permute.xlu0 %249 }
  0xc5   : > { %vm296_vm2 = vcmp.eq.s32.totalorder %v3186_v48, %v3164_v34  ;;  %vm294_vm3 = vcmp.eq.s32.totalorder %v3188_v58, %v3164_v34  ;;  %v440_v36 = vand.u32 4294901760, %v3184_v42  ;;  %v460_v3 = vand.u32 4294901760, %v3182_v9 }
  0xc6   : > { %v1783_v49 = vsel %vm296_vm2, 1.0, %v3705_v62  ;;  %v1781_v61 = vsel %vm294_vm3, 1.0, %v3705_v62 }
  0xc7   : > { %v3204_v6 = vsub.f32 %v1783_v49, %v1783_v49  ;;  %v3206_v8 = vsub.f32 %v1781_v61, %v1781_v61  ;;  %2244 = vmatprep.mubr.f32.mxu0 %v440_v36  ;;  %v441_v10 = vsub.f32 %v3184_v42, %v440_v36  ;;  %v461_v30 = vsub.f32 %v3182_v9, %v460_v3 }
  0xc8   : > { %v3209_v37 = vpop.permute.xlu1 %261  ;;  %v3211_v50 = vpop.permute.xlu0 %258 }
  0xc9   : > { %vm298_vm4 = vcmp.eq.s32.totalorder %v3209_v37, %v3164_v34  ;;  %vm297_vm5 = vcmp.eq.s32.totalorder %v3211_v50, %v3164_v34  ;;  %v442_v4 = vand.u32 4294901760, %v441_v10  ;;  %v450_v11 = vand.u32 4294901760, %v3206_v8 }
  0xca   : > { %v1785_v16 = vsel %vm298_vm4, 1.0, %v3705_v62  ;;  %v1784_v24 = vsel %vm297_vm5, 1.0, %v3705_v62  ;;  %v470_v29 = vand.u32 4294901760, %v3204_v6  ;;  %v462_v36 = vand.u32 4294901760, %v461_v30 }
  0xcb   : > { %v3228_v33 = vsub.f32 %v1785_v16, %v1785_v16  ;;  %v3230_v38 = vsub.f32 %v1784_v24, %v1784_v24  ;;  %2076 = vmatprep.mubr.f32.mxu1 %v442_v4  ;;  %2245 = vmatmul.mubr.f32.vlgmr.msra.gmra.mrb[0].mxu0 %v450_v11  ;;  %v451_v27 = vsub.f32 %v3206_v8, %v450_v11 }
  0xcc   : > { %v3233_v21 = vpop.permute.xlu1 %267  ;;  %2247 = vmatprep.mubr.f32.mxu0 %v460_v3  ;;  %2511 = vmatpush3.bf16.msra.mxu0 %v3119_v17  ;;  %v3236_v22 = vpop.permute.xlu0 %264  ;;  %v471_v41 = vsub.f32 %v3204_v6, %v470_v29 }
  0xcd   : > { %vm300_vm6 = vcmp.eq.s32.totalorder %v3233_v21, %v3164_v34  ;;  %vm299_vm7 = vcmp.eq.s32.totalorder %v3236_v22, %v3164_v34  ;;  %v452_v32 = vand.u32 4294901760, %v451_v27  ;;  %2513 = vmatprep.subr.bf16.mxu0 %v3004_v51  ;;  %v480_v63 = vand.u32 4294901760, %v3230_v38 }
  0xce   : > { %v1787_v17 = vsel %vm300_vm6, 1.0, %v3705_v62  ;;  %v1786_v7 = vsel %vm299_vm7, 1.0, %v3705_v62  ;;  %v490_v49 = vand.u32 4294901760, %v3228_v33  ;;  %v472_v16 = vand.u32 4294901760, %v471_v41 }
  0xcf   : > { %v3254_v61 = vsub.f32 %v1787_v17, %v1787_v17  ;;  %v3256_v3 = vsub.f32 %v1786_v7, %v1786_v7  ;;  %2077 = vmatmul.mubr.f32.vlgmr.msra.gmra.mrb[0].mxu1 %v452_v32  ;;  %2248 = vmatmul.mubr.f32.gmra.mrb[2].mxu0 %v470_v29  ;;  %v481_v10 = vsub.f32 %v3230_v38, %v480_v63 }
  0xd0   : > { %2415 = vmatpush3.bf16.msra.mxu1 %v3125_v28  ;;  %v3260_v4 = vpop.permute.xlu1 %273  ;;  %2079 = vmatprep.mubr.f32.mxu1 %v462_v36  ;;  %v3262_v11 = vpop.permute.xlu0 %270  ;;  %v491_v24 = vsub.f32 %v3228_v33, %v490_v49 }
  0xd1   : > { %3714 = vst [vmem:[#allocation8_spill] sm:$0xff] %v3254_v61  ;;  %3715 = vst [vmem:[#allocation9_spill] sm:$0xff] %v3256_v3  ;;  %vm302_vm8 = vcmp.eq.s32.totalorder %v3260_v4, %v3164_v34  ;;  %2250 = vmatprep.mubr.f32.mxu0 %v480_v63  ;;  %2515 = vmatpush3.bf16.msra.mxu0 %v3004_v51  ;;  %vm301_vm9 = vcmp.eq.s32.totalorder %v3262_v11, %v3164_v34  ;;  %v482_v29 = vand.u32 4294901760, %v481_v10 }
  0xd2   : > { %v500_v28 = vand.u32 4294901760, %v3256_v3  ;;  %v1789_v30 = vsel %vm302_vm8, 1.0, %v3705_v62  ;;  %v1788_v27 = vsel %vm301_vm9, 1.0, %v3705_v62  ;;  %2417 = vmatprep.subr.bf16.mxu1 %v3037_v5  ;;  %2517 = vmatprep.subr.bf16.mxu0 %v3012_v57  ;;  %v510_v51 = vand.u32 4294901760, %v3254_v61 }
  0xd3   : > { %v3282_v41 = vsub.f32 %v1789_v30, %v1789_v30  ;;  %v3284_v32 = vsub.f32 %v1788_v27, %v1788_v27  ;;  %2080 = vmatmul.mubr.f32.gmra.mrb[2].mxu1 %v472_v16  ;;  %2251 = vmatmul.mubr.f32.gmra.mrb[4].mxu0 %v490_v49  ;;  %v492_v36 = vand.u32 4294901760, %v491_v24 }
  0xd4   : > { %v501_v63 = vsub.f32 %v3256_v3, %v500_v28  ;;  %2419 = vmatpush3.bf16.msra.mxu1 %v3037_v5  ;;  %v3288_v17 = vpop.permute.xlu1 %279  ;;  %2082 = vmatprep.mubr.f32.mxu1 %v482_v29  ;;  %v3290_v7 = vpop.permute.xlu0 %276  ;;  %v511_v10 = vsub.f32 %v3254_v61, %v510_v51 }
  0xd5   : > { %3716 = vst [vmem:[#allocation10_spill] sm:$0xff] %v3282_v41  ;;  %3717 = vst [vmem:[#allocation11_spill] sm:$0xff] %v3284_v32  ;;  %vm304_vm10 = vcmp.eq.s32.totalorder %v3288_v17, %v3164_v34  ;;  %2253 = vmatprep.mubr.f32.mxu0 %v500_v28  ;;  %2519 = vmatpush3.bf16.msra.mxu0 %v3012_v57  ;;  %vm303_vm11 = vcmp.eq.s32.totalorder %v3290_v7, %v3164_v34  ;;  %v520_v5 = vand.u32 4294901760, %v3284_v32 }
  0xd6   : > { %v502_v49 = vand.u32 4294901760, %v501_v63  ;;  %v1791_v16 = vsel %vm304_vm10, 1.0, %v3705_v62  ;;  %v1790_v24 = vsel %vm303_vm11, 1.0, %v3705_v62  ;;  %2421 = vmatprep.subr.bf16.mxu1 %v3046_v13  ;;  %2521 = vmatprep.subr.bf16.mxu0 %v3055_v15  ;;  %v530_v57 = vand.u32 4294901760, %v3282_v41 }
  0xd7   : > { %v3310_v29 = vsub.f32 %v1791_v16, %v1791_v16  ;;  %v3312_v28 = vsub.f32 %v1790_v24, %v1790_v24  ;;  %2083 = vmatmul.mubr.f32.gmra.mrb[4].mxu1 %v492_v36  ;;  %2254 = vmatmul.mubr.f32.gmra.mrb[6].mxu0 %v510_v51  ;;  %v521_v30 = vsub.f32 %v3284_v32, %v520_v5  ;;  %v512_v62 = vand.u32 4294901760, %v511_v10 }
  0xd8   : > { %2423 = vmatpush3.bf16.msra.mxu1 %v3046_v13  ;;  %v3316_v27 = vpop.permute.xlu1 %285  ;;  %2085 = vmatprep.mubr.f32.mxu1 %v502_v49  ;;  %v3318_v63 = vpop.permute.xlu0 %282  ;;  %v531_v61 = vsub.f32 %v3282_v41, %v530_v57  ;;  %v3719_v36 = vmov 0.0  }
  0xd9   : > { %3718 = vst [vmem:[#allocation12_spill] sm:$0xff] %v3310_v29  ;;  %vm306_vm12 = vcmp.eq.s32.totalorder %v3316_v27, %v3164_v34  ;;  %2256 = vmatprep.mubr.f32.mxu0 %v520_v5  ;;  %2523 = vmatpush3.bf16.msra.mxu0 %v3055_v15  ;;  %vm305_vm13 = vcmp.eq.s32.totalorder %v3318_v63, %v3164_v34  ;;  %v522_v51 = vand.u32 4294901760, %v521_v30  ;;  %v540_v13 = vand.u32 4294901760, %v3312_v28 }
  0xda   : > { %v1793_v49 = vsel %vm306_vm12, 1.0, %v3719_v36  ;;  %v1792_v10 = vsel %vm305_vm13, 1.0, %v3719_v36  ;;  %2425 = vmatprep.subr.bf16.mxu1 %v3090_v47  ;;  %2525 = vmatprep.subr.bf16.mxu0 %v3078_v35  ;;  %v550_v15 = vand.u32 4294901760, %v3310_v29  ;;  %v532_v32 = vand.u32 4294901760, %v531_v61 }
  0xdb   : > { %v3338_v5 = vsub.f32 %v1793_v49, %v1793_v49  ;;  %v3340_v16 = vsub.f32 %v1792_v10, %v1792_v10  ;;  %2086 = vmatmul.mubr.f32.gmra.mrb[6].mxu1 %v512_v62  ;;  %2257 = vmatmul.mubr.f32.gmra.mrb[8].mxu0 %v530_v57  ;;  %v541_v24 = vsub.f32 %v3312_v28, %v540_v13 }
  0xdc   : > { %2427 = vmatpush3.bf16.msra.mxu1 %v3090_v47  ;;  %v3344_v30 = vpop.permute.xlu1 %291  ;;  %2088 = vmatprep.mubr.f32.mxu1 %v522_v51  ;;  %v3346_v41 = vpop.permute.xlu0 %288  ;;  %v551_v3 = vsub.f32 %v3310_v29, %v550_v15 }
  0xdd   : > { %vm308_vm14 = vcmp.eq.s32.totalorder %v3344_v30, %v3164_v34  ;;  %2259 = vmatprep.mubr.f32.mxu0 %v540_v13  ;;  %2527 = vmatpush3.bf16.msra.mxu0 %v3078_v35  ;;  %vm307_vm15 = vcmp.eq.s32.totalorder %v3346_v41, %v3164_v34  ;;  %v542_v62 = vand.u32 4294901760, %v541_v24  ;;  %v560_v47 = vand.u32 4294901760, %v3340_v16 }
  0xde   : > { %v1795_v57 = vsel %vm308_vm14, 1.0, %v3719_v36  ;;  %v1794_v61 = vsel %vm307_vm15, 1.0, %v3719_v36  ;;  %2429 = vmatprep.subr.bf16.mxu1 %v3099_v56  ;;  %2529 = vmatprep.subr.bf16.mxu0 %v3110_v2  ;;  %v570_v35 = vand.u32 4294901760, %v3338_v5  ;;  %v552_v10 = vand.u32 4294901760, %v551_v3 }
  0xdf   : > { %v3366_v51 = vsub.f32 %v1795_v57, %v1795_v57  ;;  %v3368_v13 = vsub.f32 %v1794_v61, %v1794_v61  ;;  %2089 = vmatmul.mubr.f32.gmra.mrb[8].mxu1 %v532_v32  ;;  %2260 = vmatmul.mubr.f32.gmra.mrb[10].mxu0 %v550_v15  ;;  %v561_v49 = vsub.f32 %v3340_v16, %v560_v47 }
  0xe0   : > { %2431 = vmatpush3.bf16.msra.mxu1 %v3099_v56  ;;  %2091 = vmatprep.mubr.f32.mxu1 %v542_v62  ;;  %v571_v29 = vsub.f32 %v3338_v5, %v570_v35 }
  0xe1   : > { %2262 = vmatprep.mubr.f32.mxu0 %v560_v47  ;;  %2531 = vmatpush3.bf16.msra.mxu0 %v3110_v2  ;;  %v562_v36 = vand.u32 4294901760, %v561_v49  ;;  %v580_v24 = vand.u32 4294901760, %v3368_v13  ;;  %v590_v57 = vand.u32 4294901760, %v3366_v51 }
  0xe2   : > { %2433 = vmatprep.subr.bf16.mxu1 %v3121_v23  ;;  %2533 = vmatprep.subr.bf16.mxu0 %v3114_v55  ;;  %v572_v2 = vand.u32 4294901760, %v571_v29 }
  0xe3   : > { %2092 = vmatmul.mubr.f32.gmra.mrb[10].mxu1 %v552_v10  ;;  %2263 = vmatmul.mubr.f32.gmra.mrb[12].mxu0 %v570_v35  ;;  %v581_v56 = vsub.f32 %v3368_v13, %v580_v24  ;;  %v591_v32 = vsub.f32 %v3366_v51, %v590_v57 }
  0xe4   : > { %2435 = vmatpush3.bf16.msra.mxu1 %v3121_v23  ;;  %2094 = vmatprep.mubr.f32.mxu1 %v562_v36  ;;  %v2814_v23 = vmov 1.0  }
  0xe5   : > { %2265 = vmatprep.mubr.f32.mxu0 %v580_v24  ;;  %2535 = vmatpush3.bf16.msra.mxu0 %v3114_v55  ;;  %v582_v3 = vand.u32 4294901760, %v581_v56  ;;  %v592_v55 = vand.u32 4294901760, %v591_v32 }
  0xe6   : > { %2437 = vmatprep.subr.bf16.mxu1 %v3127_v12  ;;  %2537 = vmatprep.subr.bf16.mxu0 %v3131_v14 }
  0xe7   : > { %2095 = vmatmul.mubr.f32.gmra.mrb[12].mxu1 %v572_v2  ;;  %2266 = vmatmul.mubr.f32.gmra.mrb[14].mxu0 %v590_v57 }
  0xe8   : > { %2439 = vmatpush3.bf16.msra.mxu1 %v3127_v12  ;;  %2097 = vmatprep.mubr.f32.mxu1 %v582_v3 }
  0xe9   : > { %2539 = vmatpush3.bf16.msra.mxu0 %v3131_v14  ;;  %2300 = vmatprep.mubr.msk.f32.mxu0 %vm293_vm1, %v2814_v23 }
  0xea   : > { %2441 = vmatprep.subr.bf16.mxu1 %v3135_v44  ;;  %2541 = vmatprep.subr.bf16.mxu0 %v2953_v18 }
  0xeb   : > { %2098 = vmatmul.mubr.f32.gmra.mrb[14].mxu1 %v592_v55 }
  0xec   : > { %2443 = vmatpush3.bf16.msra.mxu1 %v3135_v44  ;;  %2301 = vmatmul.mubr.msk.f32.vlgmr.msra.gmra.mrb[0].mxu0 %vm294_vm3, %v2814_v23 }
  0xed   : > { %2132 = vmatprep.mubr.msk.f32.mxu1 %vm293_vm1, %v2814_v23  ;;  %2303 = vmatprep.mubr.msk.f32.mxu0 %vm295_vm0, %v2814_v23 }
  0xee   : > { %2543 = vmatpush3.bf16.msra.mxu0 %v2953_v18  ;;  %2445 = vmatprep.subr.bf16.mxu1 %v3139_v46  ;;  %v3720_v18 = vld [vmem:[#allocation9_spill] sm:$0xff] }
  0xef   : > { %2133 = vmatmul.mubr.msk.f32.vlgmr.msra.gmra.mrb[0].mxu1 %vm294_vm3, %v2814_v23  ;;  %2545 = vmatprep.subr.bf16.mxu0 %v2955_v19 }
  0xf0   : > { %2447 = vmatpush3.bf16.msra.mxu1 %v3139_v46  ;;  %2304 = vmatmul.mubr.msk.f32.gmra.mrb[2].mxu0 %vm296_vm2, %v2814_v23 }
  0xf1   : > { %2135 = vmatprep.mubr.msk.f32.mxu1 %vm295_vm0, %v2814_v23  ;;  %2306 = vmatprep.mubr.msk.f32.mxu0 %vm297_vm5, %v2814_v23 }
  0xf2   : > { %2547 = vmatpush3.bf16.msra.mxu0 %v2955_v19  ;;  %2449 = vmatprep.subr.bf16.mxu1 %v3143_v31  ;;  %v3721_v19 = vld [vmem:[#allocation8_spill] sm:$0xff] }
  0xf3   : > { %2136 = vmatmul.mubr.msk.f32.gmra.mrb[2].mxu1 %vm296_vm2, %v2814_v23  ;;  %2549 = vmatprep.subr.bf16.mxu0 %v2967_v26 }
  0xf4   : > { %2451 = vmatpush3.bf16.msra.mxu1 %v3143_v31  ;;  %2307 = vmatmul.mubr.msk.f32.gmra.mrb[4].mxu0 %vm298_vm4, %v2814_v23 }
  0xf5   : > { %2138 = vmatprep.mubr.msk.f32.mxu1 %vm297_vm5, %v2814_v23  ;;  %2309 = vmatprep.mubr.msk.f32.mxu0 %vm299_vm7, %v2814_v23 }
  0xf6   : > { %2551 = vmatpush3.bf16.msra.mxu0 %v2967_v26  ;;  %2453 = vmatprep.subr.bf16.mxu1 %v3147_v43  ;;  %v3722_v26 = vld [vmem:[#allocation11_spill] sm:$0xff] }
  0xf7   : > { %2139 = vmatmul.mubr.msk.f32.gmra.mrb[4].mxu1 %vm298_vm4, %v2814_v23  ;;  %2553 = vmatprep.subr.bf16.mxu0 %v2997_v45 }
  0xf8   : > { %2455 = vmatpush3.bf16.msra.mxu1 %v3147_v43  ;;  %2310 = vmatmul.mubr.msk.f32.gmra.mrb[6].mxu0 %vm300_vm6, %v2814_v23 }
  0xf9   : > { %2141 = vmatprep.mubr.msk.f32.mxu1 %vm299_vm7, %v2814_v23  ;;  %2312 = vmatprep.mubr.msk.f32.mxu0 %vm301_vm9, %v2814_v23 }
  0xfa   : > { %2555 = vmatpush3.bf16.msra.mxu0 %v2997_v45  ;;  %2457 = vmatprep.subr.bf16.mxu1 %v3151_v52  ;;  %v3723_v45 = vld [vmem:[#allocation10_spill] sm:$0xff] }
  0xfb   : > { %2142 = vmatmul.mubr.msk.f32.gmra.mrb[6].mxu1 %vm300_vm6, %v2814_v23  ;;  %2557 = vmatprep.subr.bf16.mxu0 %v3029_v0 }
  0xfc   : > { %2459 = vmatpush3.bf16.msra.mxu1 %v3151_v52  ;;  %2313 = vmatmul.mubr.msk.f32.gmra.mrb[8].mxu0 %vm302_vm8, %v2814_v23 }
  0xfd   : > { %2144 = vmatprep.mubr.msk.f32.mxu1 %vm301_vm9, %v2814_v23  ;;  %2315 = vmatprep.mubr.msk.f32.mxu0 %vm303_vm11, %v2814_v23 }
  0xfe   : > { %2559 = vmatpush3.bf16.msra.mxu0 %v3029_v0  ;;  %2461 = vmatprep.subr.bf16.mxu1 %v3155_v53  ;;  %v3724_v0 = vld [vmem:[#allocation12_spill] sm:$0xff] }
  0xff   : > { %2145 = vmatmul.mubr.msk.f32.gmra.mrb[8].mxu1 %vm302_vm8, %v2814_v23  ;;  %2561 = vmatprep.subr.bf16.mxu0 %v3065_v20 }
 0x100   : > { %2463 = vmatpush3.bf16.msra.mxu1 %v3155_v53  ;;  %2316 = vmatmul.mubr.msk.f32.gmra.mrb[10].mxu0 %vm304_vm10, %v2814_v23 }
 0x101   : > { %2147 = vmatprep.mubr.msk.f32.mxu1 %vm303_vm11, %v2814_v23  ;;  %2318 = vmatprep.mubr.msk.f32.mxu0 %vm305_vm13, %v2814_v23 }
 0x102   : > { %2563 = vmatpush3.bf16.msra.mxu0 %v3065_v20  ;;  %2465 = vmatprep.subr.bf16.mxu1 %v3158_v54 }
 0x103   : > { %2148 = vmatmul.mubr.msk.f32.gmra.mrb[10].mxu1 %vm304_vm10, %v2814_v23  ;;  %2565 = vmatprep.subr.bf16.mxu0 %v3073_v25 }
 0x104   : > { %2467 = vmatpush3.bf16.msra.mxu1 %v3158_v54  ;;  %2319 = vmatmul.mubr.msk.f32.gmra.mrb[12].mxu0 %vm306_vm12, %v2814_v23 }
 0x105   : > { %2150 = vmatprep.mubr.msk.f32.mxu1 %vm305_vm13, %v2814_v23  ;;  %2321 = vmatprep.mubr.msk.f32.mxu0 %vm307_vm15, %v2814_v23 }
 0x106   : > { %2567 = vmatpush3.bf16.msra.mxu0 %v3073_v25  ;;  %2469 = vmatprep.subr.bf16.mxu1 %v3160_v60 }
 0x107   : > { %2151 = vmatmul.mubr.msk.f32.gmra.mrb[12].mxu1 %vm306_vm12, %v2814_v23  ;;  %2569 = vmatprep.subr.bf16.mxu0 %v3108_v59 }
 0x108   : > { %2471 = vmatpush3.bf16.msra.mxu1 %v3160_v60  ;;  %2322 = vmatmul.mubr.msk.f32.gmra.mrb[14].mxu0 %vm308_vm14, %v2814_v23 }
 0x109   : > { %2153 = vmatprep.mubr.msk.f32.mxu1 %vm307_vm15, %v2814_v23  ;;  %2356 = vmatprep.mubr.msk.f32.mxu0 %vm293_vm1, %v2814_v23 }
 0x10a   : > { %2571 = vmatpush3.bf16.msra.mxu0 %v3108_v59  ;;  %2473 = vmatprep.subr.bf16.mxu1 %v3162_v1 }
 0x10b   : > { %2154 = vmatmul.mubr.msk.f32.gmra.mrb[14].mxu1 %vm308_vm14, %v2814_v23 }
 0x10c   : > { %2475 = vmatpush3.bf16.msra.mxu1 %v3162_v1  ;;  %2188 = vmatprep.mubr.f32.mxu1 %v3184_v42 }
 0x10d   : > { %2357 = vmatmul.mubr.msk.f32.vlgmr.msra.gmra.mrb[0].mxu0 %vm294_vm3, %v2814_v23 }
 0x10e   : > { %2359 = vmatprep.mubr.msk.f32.mxu0 %vm295_vm0, %v2814_v23 }
 0x10f   : > { %2189 = vmatmul.mubr.f32.vlgmr.msra.gmra.mrb[0].mxu1 %v3206_v8 }
 0x110   : > { %2191 = vmatprep.mubr.f32.mxu1 %v3182_v9 }
 0x111   : > { %2360 = vmatmul.mubr.msk.f32.gmra.mrb[2].mxu0 %vm296_vm2, %v2814_v23 }
 0x112   : > { %2362 = vmatprep.mubr.msk.f32.mxu0 %vm297_vm5, %v2814_v23 }
 0x113   : > { %2192 = vmatmul.mubr.f32.gmra.mrb[2].mxu1 %v3204_v6 }
 0x114   : > { %2194 = vmatprep.mubr.f32.mxu1 %v3230_v38 }
 0x115   : > { %2363 = vmatmul.mubr.msk.f32.gmra.mrb[4].mxu0 %vm298_vm4, %v2814_v23 }
 0x116   : > { %2365 = vmatprep.mubr.msk.f32.mxu0 %vm299_vm7, %v2814_v23 }
 0x117   : > { %2195 = vmatmul.mubr.f32.gmra.mrb[4].mxu1 %v3228_v33 }
 0x118   : > { %2197 = vmatprep.mubr.f32.mxu1 %v3720_v18 }
 0x119   : > { %2366 = vmatmul.mubr.msk.f32.gmra.mrb[6].mxu0 %vm300_vm6, %v2814_v23 }
 0x11a   : > { %2368 = vmatprep.mubr.msk.f32.mxu0 %vm301_vm9, %v2814_v23 }
 0x11b   : > { %2198 = vmatmul.mubr.f32.gmra.mrb[6].mxu1 %v3721_v19 }
 0x11c   : > { %2200 = vmatprep.mubr.f32.mxu1 %v3722_v26 }
 0x11d   : > { %2369 = vmatmul.mubr.msk.f32.gmra.mrb[8].mxu0 %vm302_vm8, %v2814_v23 }
 0x11e   : > { %2371 = vmatprep.mubr.msk.f32.mxu0 %vm303_vm11, %v2814_v23 }
 0x11f   : > { %2201 = vmatmul.mubr.f32.gmra.mrb[8].mxu1 %v3723_v45 }
 0x120   : > { %2203 = vmatprep.mubr.f32.mxu1 %v3312_v28 }
 0x121   : > { %2372 = vmatmul.mubr.msk.f32.gmra.mrb[10].mxu0 %vm304_vm10, %v2814_v23 }
 0x122   : > { %2374 = vmatprep.mubr.msk.f32.mxu0 %vm305_vm13, %v2814_v23 }
 0x123   : > { %2204 = vmatmul.mubr.f32.gmra.mrb[10].mxu1 %v3724_v0 }
 0x124   : > { %2206 = vmatprep.mubr.f32.mxu1 %v3340_v16 }
 0x125   : > { %2375 = vmatmul.mubr.msk.f32.gmra.mrb[12].mxu0 %vm306_vm12, %v2814_v23 }
 0x126   : > { %2377 = vmatprep.mubr.msk.f32.mxu0 %vm307_vm15, %v2814_v23 }
 0x127   : > { %2207 = vmatmul.mubr.f32.gmra.mrb[12].mxu1 %v3338_v5 }
 0x128   : > { %2209 = vmatprep.mubr.f32.mxu1 %v3368_v13 }
 0x129   : > { %2378 = vmatmul.mubr.msk.f32.gmra.mrb[14].mxu0 %vm308_vm14, %v2814_v23 }
 0x12b   : > { %2210 = vmatmul.mubr.f32.gmra.mrb[14].mxu1 %v3366_v51 }
 0x1e0   : > { %v2358_v20 = vpop.f32.mrb[0].mxu0 }
 0x1e1   : > { %v1549_v25 = vpop.f32.mrb[1].mxu0 }
 0x1e2   : > { %v2190_v59 = vpop.f32.mrb[0].mxu1 }
 0x1e3   : > { %v2572_v12 = vadd.f32 %v2358_v20, %v2190_v59  ;;  %v939_v14 = vpop.f32.mrb[1].mxu1 }
 0x1e4   : > { %v2361_v44 = vpop.f32.mrb[2].mxu0  ;;  %v2573_v46 = vadd.f32 %v1549_v25, %v939_v14 }
 0x1e5   : > { %1644 = vst [vmem:[%s2912_s14 + $0x8] sm:$0xff] %v2572_v12  ;;  %v1561_v31 = vpop.f32.mrb[3].mxu0 }
 0x1e6   : > { %1643 = vst [vmem:[%s2912_s14] sm:$0xff] %v2573_v46  ;;  %v2193_v43 = vpop.f32.mrb[2].mxu1 }
 0x1e7   : > { %v2574_v52 = vadd.f32 %v2361_v44, %v2193_v43  ;;  %v953_v53 = vpop.f32.mrb[3].mxu1 }
 0x1e8   : > { %v2364_v54 = vpop.f32.mrb[4].mxu0  ;;  %v2575_v60 = vadd.f32 %v1561_v31, %v953_v53 }
 0x1e9   : > { %1646 = vst [vmem:[%s2912_s14 + $0x18] sm:$0xff] %v2574_v52  ;;  %v1573_v1 = vpop.f32.mrb[5].mxu0 }
 0x1ea   : > { %1645 = vst [vmem:[%s2912_s14 + $0x10] sm:$0xff] %v2575_v60  ;;  %v2196_v34 = vpop.f32.mrb[4].mxu1 }
 0x1eb   : > { %v2576_v39 = vadd.f32 %v2364_v54, %v2196_v34  ;;  %v967_v40 = vpop.f32.mrb[5].mxu1 }
 0x1ec   : > { %v2367_v9 = vpop.f32.mrb[6].mxu0  ;;  %v2577_v42 = vadd.f32 %v1573_v1, %v967_v40 }
 0x1ed   : > { %1648 = vst [vmem:[%s2912_s14 + $0x28] sm:$0xff] %v2576_v39  ;;  %v1585_v48 = vpop.f32.mrb[7].mxu0 }
 0x1ee   : > { %1647 = vst [vmem:[%s2912_s14 + $0x20] sm:$0xff] %v2577_v42  ;;  %v2199_v58 = vpop.f32.mrb[6].mxu1 }
 0x1ef   : > { %v2578_v6 = vadd.f32 %v2367_v9, %v2199_v58  ;;  %v981_v8 = vpop.f32.mrb[7].mxu1 }
 0x1f0   : > { %v2370_v37 = vpop.f32.mrb[8].mxu0  ;;  %v2579_v50 = vadd.f32 %v1585_v48, %v981_v8 }
 0x1f1   : > { %1650 = vst [vmem:[%s2912_s14 + $0x38] sm:$0xff] %v2578_v6  ;;  %v1597_v33 = vpop.f32.mrb[9].mxu0 }
 0x1f2   : > { %1649 = vst [vmem:[%s2912_s14 + $0x30] sm:$0xff] %v2579_v50  ;;  %v2202_v38 = vpop.f32.mrb[8].mxu1 }
 0x1f3   : > { %v2580_v21 = vadd.f32 %v2370_v37, %v2202_v38  ;;  %v995_v22 = vpop.f32.mrb[9].mxu1 }
 0x1f4   : > { %v2373_v4 = vpop.f32.mrb[10].mxu0  ;;  %v2581_v11 = vadd.f32 %v1597_v33, %v995_v22 }
 0x1f5   : > { %1652 = vst [vmem:[%s2912_s14 + $0x48] sm:$0xff] %v2580_v21  ;;  %v1609_v41 = vpop.f32.mrb[11].mxu0 }
 0x1f6   : > { %1651 = vst [vmem:[%s2912_s14 + $0x40] sm:$0xff] %v2581_v11  ;;  %v2205_v17 = vpop.f32.mrb[10].mxu1 }
 0x1f7   : > { %v2582_v7 = vadd.f32 %v2373_v4, %v2205_v17  ;;  %v1009_v29 = vpop.f32.mrb[11].mxu1 }
 0x1f8   : > { %v2376_v28 = vpop.f32.mrb[12].mxu0  ;;  %v2583_v27 = vadd.f32 %v1609_v41, %v1009_v29 }
 0x1f9   : > { %1654 = vst [vmem:[%s2912_s14 + $0x58] sm:$0xff] %v2582_v7  ;;  %v1621_v63 = vpop.f32.mrb[13].mxu0 }
 0x1fa   : > { %1653 = vst [vmem:[%s2912_s14 + $0x50] sm:$0xff] %v2583_v27  ;;  %v2208_v15 = vpop.f32.mrb[12].mxu1 }
 0x1fb   : > { %v2584_v5 = vadd.f32 %v2376_v28, %v2208_v15  ;;  %v1023_v16 = vpop.f32.mrb[13].mxu1 }
 0x1fc   : > { %v2379_v30 = vpop.f32.mrb[14].mxu0  ;;  %v2585_v62 = vadd.f32 %v1621_v63, %v1023_v16 }
 0x1fd   : > { %1656 = vst [vmem:[%s2912_s14 + $0x68] sm:$0xff] %v2584_v5  ;;  %v1633_v47 = vpop.f32.mrb[15].mxu0 }
 0x1fe   : > { %1655 = vst [vmem:[%s2912_s14 + $0x60] sm:$0xff] %v2585_v62  ;;  %v2211_v61 = vpop.f32.mrb[14].mxu1 }
 0x1ff   : > { %v2586_v35 = vadd.f32 %v2379_v30, %v2211_v61  ;;  %v1037_v51 = vpop.f32.mrb[15].mxu1 }
 0x200   : > { %v2587_v13 = vadd.f32 %v1633_v47, %v1037_v51 }
 0x201   : > { %1658 = vst [vmem:[%s2912_s14 + $0x78] sm:$0xff] %v2586_v35 }
 0x202   : > { %1657 = vst [vmem:[%s2912_s14 + $0x70] sm:$0xff] %v2587_v13 }
 0x203 PF: > { %s1851_s16 = sshll.u32 %s2800_s19, 11  ;;  %s1675_s27 = sshll.u32 %s2912_s14, 4  ;;  %s3651_s27 = int_to_ptr.vmem [resolvable:$true] %s1675_s27 }
 0x204   : > { %s3648_s25 = scalar_lea.hbm %s3704_s3, %s1851_s16  ;;  %s3655_s4 = scalar_lea.sflag [#allocation5], %s181_s30 }
 0x205   : > { %s2728_s5 = scalar_lea.vmem %s3651_s27, 2048  ;;  %s2815_s19 = smov [#allocation4]  }
 0x206   : > { %p2729_p5 = scmp.ne.s32.totalorder %s3651_s27, %s2728_s5  ;;  %s2732_s6 = sshll.u32 %s2815_s19, 4  ;;  %s2733_s6 = int_to_ptr.vmem [resolvable:$false] %s2732_s6 }
 0x207   : > { %s2734_s7 = scalar_lea.vmem %s2733_s6, 4096  ;;  %p2735_p8 = scmp.lt.s32.totalorder %s3651_s27, %s2733_s6 }
 0x208   : > { %p2730_p6 = pnand %p2729_p5, %p2881_p9  ;;  %p2736_p10 = scmp.lt.s32.totalorder %s2734_s7, %s2728_s5 }
 0x20a   : > { %p2731_p7 = pneg %p2730_p6  ;;  %p2737_p11 = por %p2736_p10, %p2735_p8 }
 0x20c   : > { %p2738_p12 = pnand %p2737_p11, %p2731_p7 }
 0x20e   : > { %2741 = shalt.err (!%p2738_p12)
}
 0x20f   : > { %s2742_s30 = scalar_lea.hbm %s3648_s25, 2048  ;;  %s2746_s10 = scalar_lea.hbm %s3704_s3, 4096 }
 0x210   : > { %p2743_p0 = scmp.ne.s32.totalorder %s3648_s25, %s2742_s30  ;;  %p2747_p3 = scmp.lt.u32.totalorder %s3648_s25, %s3704_s3 }
 0x211   : > { %p2748_p4 = scmp.lt.u32.totalorder %s2746_s10, %s2742_s30  ;;  %p2750_p6 = scmp.lt.u32.totalorder %s2742_s30, %s3648_s25 }
 0x212   : > { %p2744_p1 = pnand %p2743_p0, %p2881_p9 }
 0x213   : > { %p2749_p5 = por %p2748_p4, %p2747_p3 }
 0x214   : > { %p2745_p2 = pneg %p2744_p1 }
 0x215   : > { %p2751_p7 = por %p2750_p6, %p2749_p5 }
 0x217   : > { %p2752_p8 = pnand %p2751_p7, %p2745_p2 }
 0x219   : > { %2755 = shalt.err (!%p2752_p8)
}
 0x21a   : > { %s2816_s13 = smov 128   ;;  %s2817_s14 = smov 8  }
 0x21b   : > { %2652 = dma.vmem_to_hbm [thread:$0]  (%p2881_p9), %s3651_s27, 2048, %s3648_s25, %s3655_s4, %s2816_s13, %s2816_s13, %s2817_s14  }
 0x21c PF: > { %p2658_p10 = scmp.ge.s32.totalorder %s2808_s21, 2  ;;  %s1690_s15 = sand.u32 1, %s2788_s17  }
 0x21d   : > { %s1691_s16 = scalar_lea.sflag [#allocation5], %s1690_s15 }
 0x21e   : > { %p2655_p11 = pnand %p2658_p10, %p2888_p13 }
 0x220   : > { %2783 = dma.done.wait (!%p2655_p11), %s1691_s16, 2048  }
 0x221   : > { %2785 = vsyncadd (!%p2655_p11), %s1691_s16, 4294965248  ;;  %s22_s21 = sadd.s32 1, %s2808_s21   ;;  %s3725_s17 = smov %s2792_s18 }
 0x222   : > { %p19_p12 = scmp.ge.s32.totalorder %s22_s21, 4   ;;  %s3726_s18 = smov %s2796_s0 }
 0x223   : > { %s3727_s0 = smov %s2894_s29  ;;  %s3728_s19 = smov %s2804_s20 }
 0x224   : > { %s3729_s20 = smov %s3731_s24  ;;  %21 = sbr.rel (!%p19_p12) target bundleno = 19 (0x13), region = 74 }
 0x22b   :  { %1696 = vsyncpa [#allocation5], 1 }
 0x22c   :  { %1698 = vsyncpa [#allocation5 + $0x1], 1 }

</bundles_post_ra>
